<compile_context>
chip_gen: v7x
topology: tpu7x:2x2x1
jax: 0.10.0
libtpu: 0.0.40
codegen_flags: <defaults>
</compile_context>

<pallas_src>
import numpy as np
import jax
import jax.numpy as jnp
from jax.experimental import pallas as pl
from jax.experimental.pallas import tpu as pltpu

B = 2          # batch
H = W = 7      # minigrid obs_space['image'][0:2]
C_IN = 3
N_ACT = 7      # minigrid action_space.n
EMB = 64       # ((7-1)//2 - 2) * ((7-1)//2 - 2) * 64 == semi_memory_size
SUB = 8        # f32 sublane count -> pad batch rows to a multiple of this

# TODO(synk): use_rim=True (RIMCell) and use_text=True (GRU text encoder)
# branches are not exercised by the default config and are not implemented here.


# ----------------------------------------------------------------------------
# Pallas kernel: whole forward pass, grid = () (everything fits in VMEM)
# ----------------------------------------------------------------------------
def acmodel_kernel(patch_ref, h_ref, c_ref,
                   w1_ref, b1_ref, w2_ref, b2_ref, w3_ref, b3_ref,
                   wih_ref, whh_ref, bg_ref,
                   wh1_ref, bh1_ref, wh2_ref, bh2_ref,
                   logp_ref, value_ref, mem_ref):
    f32 = jnp.float32
    bp = h_ref.shape[0]                 # padded batch rows (multiple of 8)

    def mm(a, b):
        return jnp.dot(a, b, preferred_element_type=f32)

    def sigmoid(z):                     # single EUP op instead of exp + divide
        return 0.5 * jnp.tanh(0.5 * z) + 0.5

    # --- conv1 (3->16, 2x2, valid) + ReLU: ONE matmul on pre-gathered patches.
    # Row layout: row = pool_tap * bp + b
    # Col layout: col = (conv2_out_pixel*4 + conv2_tap)*16 + channel
    h1 = jnp.maximum(mm(patch_ref[...], w1_ref[...]) + b1_ref[...], 0.0)     # (4*bp, 256)

    # --- maxpool 2x2 stride 2 on the VPU: max of the 4 pool-tap row blocks ---
    pooled = jnp.maximum(jnp.maximum(h1[0 * bp:1 * bp], h1[1 * bp:2 * bp]),
                         jnp.maximum(h1[2 * bp:3 * bp], h1[3 * bp:4 * bp]))  # (bp, 256)

    # --- conv2 (16->32, 2x2) + ReLU and conv3 (32->64, 2x2) + ReLU: 1 matmul each
    h2 = jnp.maximum(mm(pooled, w2_ref[...]) + b2_ref[...], 0.0)             # (bp, 128)
    emb = jnp.maximum(mm(h2, w3_ref[...]) + b3_ref[...], 0.0)                # (bp, 64)

    # --- LSTMCell with fused gates (order i, f, g, o) ------------------------
    h_prev = h_ref[...]
    c_prev = c_ref[...]
    gates = mm(emb, wih_ref[...]) + mm(h_prev, whh_ref[...]) + bg_ref[...]   # (bp, 256)
    i_g = sigmoid(gates[:, 0 * EMB:1 * EMB])
    f_g = sigmoid(gates[:, 1 * EMB:2 * EMB])
    g_g = jnp.tanh(gates[:, 2 * EMB:3 * EMB])
    o_g = sigmoid(gates[:, 3 * EMB:4 * EMB])
    c_new = f_g * c_prev + i_g * g_g
    h_new = o_g * jnp.tanh(c_new)
    mem_ref[:, 0:EMB] = h_new                    # single (bp,128) memory output
    mem_ref[:, EMB:2 * EMB] = c_new

    # --- fused actor/critic heads -------------------------------------------
    hid = jnp.tanh(mm(h_new, wh1_ref[...]) + bh1_ref[...])                   # (bp, 128)
    out = mm(hid, wh2_ref[...]) + bh2_ref[...]                               # (bp, 8)
    logits = out[:, 0:N_ACT]
    m = jnp.max(logits, axis=1, keepdims=True)
    lse = m + jnp.log(jnp.sum(jnp.exp(logits - m), axis=1, keepdims=True))
    logp_ref[...] = logits - lse                 # log-softmax (dist logits)
    value_ref[...] = out[:, N_ACT:N_ACT + 1]


# ----------------------------------------------------------------------------
# Glue: constant gather indices, folded weights, jitted wrapper
# ----------------------------------------------------------------------------
def _patch_indices():
    """(y, x) image coordinates for every conv1 im2col patch element.

    Axes: [pool_tap t, conv2_out_pixel*4 + conv2_tap, conv1_tap]."""
    idx_y = np.zeros((4, 16, 4), np.int32)
    idx_x = np.zeros((4, 16, 4), np.int32)
    for t in range(4):                       # position inside the 2x2 pool window
        ty, tx = divmod(t, 2)
        for q in range(4):                   # conv2 output pixel (== conv3 tap)
            oi, oj = divmod(q, 2)
            for p in range(4):               # conv2 tap
                dy, dx = divmod(p, 2)
                yy = 2 * (oi + dy) + ty      # conv1 output pixel
                xx = 2 * (oj + dx) + tx
                for tap in range(4):         # conv1 tap
                    ky, kx = divmod(tap, 2)
                    idx_y[t, q * 4 + p, tap] = yy + ky
                    idx_x[t, q * 4 + p, tap] = xx + kx
    return idx_y, idx_x


_IDX_Y, _IDX_X = _patch_indices()            # built once at import time


def _build_patches(img):
    """(bp, 7, 7, 3) -> (4*bp, 192) conv1 im2col patches (runs inside jit)."""
    bp = img.shape[0]
    g = img[:, _IDX_Y, _IDX_X, :]            # (bp, 4, 16, 4, 3)
    g = jnp.transpose(g, (1, 0, 2, 3, 4))    # (4, bp, 16, 4, 3)
    return g.reshape(4 * bp, 16 * 4 * C_IN)  # row = t*bp + b, col = (q*4+p)*12 + tap*3 + ci


def init_params(key):
    ks = jax.random.split(key, 16)

    def linear(k, d_in, d_out):
        # mimics init_params: normal(0,1), row-normalized, zero bias
        wt = jax.random.normal(k, (d_out, d_in), jnp.float32)
        wt = wt / jnp.sqrt(jnp.sum(wt ** 2, axis=1, keepdims=True))
        return wt.T, jnp.zeros((1, d_out), jnp.float32)

    p = {}
    # conv weights: (4 taps, Cin, Cout); tap = dy*2 + dx
    p["w1"] = 0.1 * jax.random.normal(ks[0], (4, 3, 16), jnp.float32)
    p["b1"] = 0.05 * jax.random.normal(ks[1], (1, 16), jnp.float32)
    p["w2"] = 0.1 * jax.random.normal(ks[2], (4, 16, 32), jnp.float32)
    p["b2"] = 0.05 * jax.random.normal(ks[3], (1, 32), jnp.float32)
    p["w3"] = 0.1 * jax.random.normal(ks[4], (4, 32, 64), jnp.float32)
    p["b3"] = 0.05 * jax.random.normal(ks[5], (1, 64), jnp.float32)
    # LSTMCell per-gate (i, f, g, o): W_ih^T, W_hh^T slices and combined bias
    p["wih"] = jax.random.normal(ks[6], (4, EMB, EMB), jnp.float32) / jnp.sqrt(EMB)
    p["whh"] = jax.random.normal(ks[7], (4, EMB, EMB), jnp.float32) / jnp.sqrt(EMB)
    p["bg"] = 0.05 * jax.random.normal(ks[8], (4, 1, EMB), jnp.float32)
    # actor / critic heads
    p["wa1"], p["ba1"] = linear(ks[9], EMB, 64)
    p["wa2"], p["ba2"] = linear(ks[10], 64, N_ACT)
    p["wc1"], p["bc1"] = linear(ks[11], EMB, 64)
    p["wc2"], p["bc2"] = linear(ks[12], 64, 1)
    return p


def prepare_params(params):
    """Fold/fuse module weights into kernel-ready constants. Call ONCE."""
    P = {k: np.asarray(v, np.float32) for k, v in params.items()}

    # conv1: (4,3,16) -> (12,16), then 16-way block diagonal -> (192, 256)
    w1f = P["w1"].reshape(12, 16)
    w1_blk = np.zeros((16 * 12, 16 * 16), np.float32)
    for g in range(16):
        w1_blk[g * 12:(g + 1) * 12, g * 16:(g + 1) * 16] = w1f
    b1_blk = np.tile(P["b1"], (1, 16))                                # (1, 256)

    # conv2: (4,16,32) -> (64,32), then 4-way block diagonal -> (256, 128)
    w2f = P["w2"].reshape(64, 32)
    w2_blk = np.zeros((4 * 64, 4 * 32), np.float32)
    for g in range(4):
        w2_blk[g * 64:(g + 1) * 64, g * 32:(g + 1) * 32] = w2f
    b2_blk = np.tile(P["b2"], (1, 4))                                 # (1, 128)

    # conv3: (4,32,64) -> (128, 64)
    w3f = P["w3"].reshape(128, 64)

    # LSTM fused gates (i, f, g, o)
    wih = np.concatenate([P["wih"][g] for g in range(4)], axis=1)     # (64, 256)
    whh = np.concatenate([P["whh"][g] for g in range(4)], axis=1)     # (64, 256)
    bg = np.concatenate([P["bg"][g] for g in range(4)], axis=1)       # (1, 256)

    # fused actor/critic heads
    wh1 = np.concatenate([P["wa1"], P["wc1"]], axis=1)                # (64, 128)
    bh1 = np.concatenate([P["ba1"], P["bc1"]], axis=1)                # (1, 128)
    wh2 = np.zeros((128, 8), np.float32)
    wh2[:64, :N_ACT] = P["wa2"]
    wh2[64:, N_ACT:] = P["wc2"]
    bh2 = np.concatenate([P["ba2"], P["bc2"]], axis=1)                # (1, 8)

    kp = dict(w1=w1_blk, b1=b1_blk, w2=w2_blk, b2=b2_blk, w3=w3f, b3=P["b3"],
              wih=wih, whh=whh, bg=bg, wh1=wh1, bh1=bh1, wh2=wh2, bh2=bh2)
    return {k: jnp.asarray(v) for k, v in kp.items()}


def acmodel_forward(image, memory, kp):
    """image: (b,7,7,3) NHWC f32; memory: (b,128) f32; kp: prepared params."""
    b = image.shape[0]
    bp = ((b + SUB - 1) // SUB) * SUB        # pad rows to the f32 sublane
    img_p = jnp.zeros((bp, H, W, C_IN), jnp.float32).at[:b].set(image)
    mem_p = jnp.zeros((bp, 2 * EMB), jnp.float32).at[:b].set(memory)

    patches = _build_patches(img_p)          # (4*bp, 192)
    h_in = mem_p[:, :EMB]
    c_in = mem_p[:, EMB:]

    args = (patches, h_in, c_in,
            kp["w1"], kp["b1"], kp["w2"], kp["b2"], kp["w3"], kp["b3"],
            kp["wih"], kp["whh"], kp["bg"],
            kp["wh1"], kp["bh1"], kp["wh2"], kp["bh2"])

    vmem = pl.BlockSpec(memory_space=pltpu.MemorySpace.VMEM)
    out_shape = (jax.ShapeDtypeStruct((bp, N_ACT), jnp.float32),   # log-probs
                 jax.ShapeDtypeStruct((bp, 1), jnp.float32),       # value
                 jax.ShapeDtypeStruct((bp, 2 * EMB), jnp.float32)) # new memory
    logp, value, mem_out = pl.pallas_call(
        acmodel_kernel,
        out_shape=out_shape,
        in_specs=[vmem] * len(args),
        out_specs=(vmem, vmem, vmem),
    )(*args)
    return logp[:b], value[:b, 0], mem_out[:b]


acmodel_forward_jit = jax.jit(acmodel_forward)


# ----------------------------------------------------------------------------
# Pure numpy (float64) reference for a correctness check
# ----------------------------------------------------------------------------
def ref_forward(image, memory, params):
    P = {k: np.asarray(v, np.float64) for k, v in params.items()}
    x = np.asarray(image, np.float64)

    def conv(x, w4, b):  # w4: (4, Cin, Cout), tap = dy*2 + dx
        bsz, h, w, ci = x.shape
        co = w4.shape[-1]
        ho, wo = h - 1, w - 1
        out = np.zeros((bsz, ho, wo, co))
        for p, (dy, dx) in enumerate([(0, 0), (0, 1), (1, 0), (1, 1)]):
            out += np.einsum("bhwc,co->bhwo", x[:, dy:dy + ho, dx:dx + wo, :], w4[p])
        return np.maximum(out + b, 0.0)

    h1 = conv(x, P["w1"], P["b1"])
    bsz, hh, ww, cc = h1.shape
    pooled = h1.reshape(bsz, hh // 2, 2, ww // 2, 2, cc).max(axis=(2, 4))
    h2 = conv(pooled, P["w2"], P["b2"])
    h3 = conv(h2, P["w3"], P["b3"])
    emb = h3.reshape(bsz, -1)

    mem = np.asarray(memory, np.float64)
    h_prev, c_prev = mem[:, :EMB], mem[:, EMB:]
    gates = [emb @ P["wih"][p] + h_prev @ P["whh"][p] + P["bg"][p] for p in range(4)]
    sig = lambda z: 1.0 / (1.0 + np.exp(-z))
    i_g, f_g, g_g, o_g = sig(gates[0]), sig(gates[1]), np.tanh(gates[2]), sig(gates[3])
    c_new = f_g * c_prev + i_g * g_g
    h_new = o_g * np.tanh(c_new)

    a1 = np.tanh(h_new @ P["wa1"] + P["ba1"])
    logits = a1 @ P["wa2"] + P["ba2"]
    m = np.max(logits, 1, keepdims=True)
    logits = logits - (m + np.log(np.sum(np.exp(logits - m), 1, keepdims=True)))
    c1 = np.tanh(h_new @ P["wc1"] + P["bc1"])
    value = (c1 @ P["wc2"] + P["bc2"])[:, 0]
    return logits, value, np.concatenate([h_new, c_new], axis=1)


if __name__ == "__main__":
    key = jax.random.PRNGKey(0)
    k_img, k_mem, k_par = jax.random.split(key, 3)

    image = jax.random.normal(k_img, (B, H, W, C_IN), jnp.float32)   # NHWC
    memory = 0.5 * jax.random.normal(k_mem, (B, 2 * EMB), jnp.float32)
    params = init_params(k_par)
    kparams = prepare_params(params)        # folded/fused constants, built once

    logp, value, memory_out = acmodel_forward_jit(image, memory, kparams)
    jax.block_until_ready((logp, value, memory_out))

    # sanity check against float64 numpy reference
    r_logp, r_value, r_mem = ref_forward(image, memory, params)
    np.testing.assert_allclose(np.asarray(logp), r_logp, rtol=5e-2, atol=5e-2)
    np.testing.assert_allclose(np.asarray(value), r_value, rtol=5e-2, atol=5e-2)
    np.testing.assert_allclose(np.asarray(memory_out), r_mem, rtol=5e-2, atol=5e-2)

    print("KERNEL_OK")
</pallas_src>

<mosaic_0001>
module attributes {stable_mosaic.version = 11 : i64} {
  func.func @acmodel_kernel(%arg0: memref<32x192xf32, #tpu.memory_space<vmem>>, %arg1: memref<8x64xf32, #tpu.memory_space<vmem>>, %arg2: memref<8x64xf32, #tpu.memory_space<vmem>>, %arg3: memref<192x256xf32, #tpu.memory_space<vmem>>, %arg4: memref<1x256xf32, #tpu.memory_space<vmem>>, %arg5: memref<256x128xf32, #tpu.memory_space<vmem>>, %arg6: memref<1x128xf32, #tpu.memory_space<vmem>>, %arg7: memref<128x64xf32, #tpu.memory_space<vmem>>, %arg8: memref<1x64xf32, #tpu.memory_space<vmem>>, %arg9: memref<64x256xf32, #tpu.memory_space<vmem>>, %arg10: memref<64x256xf32, #tpu.memory_space<vmem>>, %arg11: memref<1x256xf32, #tpu.memory_space<vmem>>, %arg12: memref<64x128xf32, #tpu.memory_space<vmem>>, %arg13: memref<1x128xf32, #tpu.memory_space<vmem>>, %arg14: memref<128x8xf32, #tpu.memory_space<vmem>>, %arg15: memref<1x8xf32, #tpu.memory_space<vmem>>, %arg16: memref<8x7xf32, #tpu.memory_space<vmem>>, %arg17: memref<8x1xf32, #tpu.memory_space<vmem>>, %arg18: memref<8x128xf32, #tpu.memory_space<vmem>>) attributes {dimension_semantics = [], scalar_prefetch = 0 : i64, scratch_operands = 0 : i64, tpu.core_type = #tpu.core_type<tc>} {
    %c0 = arith.constant 0 : index
    %c0_0 = arith.constant 0 : index
    %0 = vector.load %arg0[%c0, %c0_0] : memref<32x192xf32, #tpu.memory_space<vmem>>, vector<32x192xf32>
    %c0_1 = arith.constant 0 : index
    %c0_2 = arith.constant 0 : index
    %1 = vector.load %arg3[%c0_1, %c0_2] : memref<192x256xf32, #tpu.memory_space<vmem>>, vector<192x256xf32>
    %cst = arith.constant dense<0.000000e+00> : vector<32x256xf32>
    %2 = tpu.matmul %0, %1, %cst {dimension_numbers = #tpu.dot_dimension_numbers<[1], [0], [0], [1], [0, 0, 1, 1], [], []>} : vector<32x192xf32>, vector<192x256xf32>, vector<32x256xf32> -> vector<32x256xf32>
    %c0_3 = arith.constant 0 : index
    %c0_4 = arith.constant 0 : index
    %3 = vector.load %arg4[%c0_3, %c0_4] : memref<1x256xf32, #tpu.memory_space<vmem>>, vector<1x256xf32>
    %4 = vector.broadcast %3 : vector<1x256xf32> to vector<32x256xf32>
    %5 = arith.addf %2, %4 : vector<32x256xf32>
    %cst_5 = arith.constant 0.000000e+00 : f32
    %6 = vector.broadcast %cst_5 : f32 to vector<32x256xf32>
    %7 = arith.maximumf %5, %6 : vector<32x256xf32>
    %8 = vector.extract_strided_slice %7 {offsets = [0, 0], sizes = [8, 256], strides = [1, 1]} : vector<32x256xf32> to vector<8x256xf32>
    %9 = vector.extract_strided_slice %7 {offsets = [8, 0], sizes = [8, 256], strides = [1, 1]} : vector<32x256xf32> to vector<8x256xf32>
    %10 = arith.maximumf %8, %9 : vector<8x256xf32>
    %11 = vector.extract_strided_slice %7 {offsets = [16, 0], sizes = [8, 256], strides = [1, 1]} : vector<32x256xf32> to vector<8x256xf32>
    %12 = vector.extract_strided_slice %7 {offsets = [24, 0], sizes = [8, 256], strides = [1, 1]} : vector<32x256xf32> to vector<8x256xf32>
    %13 = arith.maximumf %11, %12 : vector<8x256xf32>
    %14 = arith.maximumf %10, %13 : vector<8x256xf32>
    %c0_6 = arith.constant 0 : index
    %c0_7 = arith.constant 0 : index
    %15 = vector.load %arg5[%c0_6, %c0_7] : memref<256x128xf32, #tpu.memory_space<vmem>>, vector<256x128xf32>
    %cst_8 = arith.constant dense<0.000000e+00> : vector<8x128xf32>
    %16 = tpu.matmul %14, %15, %cst_8 {dimension_numbers = #tpu.dot_dimension_numbers<[1], [0], [0], [1], [0, 0, 1, 1], [], []>} : vector<8x256xf32>, vector<256x128xf32>, vector<8x128xf32> -> vector<8x128xf32>
    %c0_9 = arith.constant 0 : index
    %c0_10 = arith.constant 0 : index
    %17 = vector.load %arg6[%c0_9, %c0_10] : memref<1x128xf32, #tpu.memory_space<vmem>>, vector<1x128xf32>
    %18 = vector.broadcast %17 : vector<1x128xf32> to vector<8x128xf32>
    %19 = arith.addf %16, %18 : vector<8x128xf32>
    %cst_11 = arith.constant 0.000000e+00 : f32
    %20 = vector.broadcast %cst_11 : f32 to vector<8x128xf32>
    %21 = arith.maximumf %19, %20 : vector<8x128xf32>
    %c0_12 = arith.constant 0 : index
    %c0_13 = arith.constant 0 : index
    %22 = vector.load %arg7[%c0_12, %c0_13] : memref<128x64xf32, #tpu.memory_space<vmem>>, vector<128x64xf32>
    %cst_14 = arith.constant dense<0.000000e+00> : vector<8x64xf32>
    %23 = tpu.matmul %21, %22, %cst_14 {dimension_numbers = #tpu.dot_dimension_numbers<[1], [0], [0], [1], [0, 0, 1, 1], [], []>} : vector<8x128xf32>, vector<128x64xf32>, vector<8x64xf32> -> vector<8x64xf32>
    %c0_15 = arith.constant 0 : index
    %c0_16 = arith.constant 0 : index
    %24 = vector.load %arg8[%c0_15, %c0_16] : memref<1x64xf32, #tpu.memory_space<vmem>>, vector<1x64xf32>
    %25 = vector.broadcast %24 : vector<1x64xf32> to vector<8x64xf32>
    %26 = arith.addf %23, %25 : vector<8x64xf32>
    %cst_17 = arith.constant 0.000000e+00 : f32
    %27 = vector.broadcast %cst_17 : f32 to vector<8x64xf32>
    %28 = arith.maximumf %26, %27 : vector<8x64xf32>
    %c0_18 = arith.constant 0 : index
    %c0_19 = arith.constant 0 : index
    %29 = vector.load %arg1[%c0_18, %c0_19] : memref<8x64xf32, #tpu.memory_space<vmem>>, vector<8x64xf32>
    %c0_20 = arith.constant 0 : index
    %c0_21 = arith.constant 0 : index
    %30 = vector.load %arg2[%c0_20, %c0_21] : memref<8x64xf32, #tpu.memory_space<vmem>>, vector<8x64xf32>
    %c0_22 = arith.constant 0 : index
    %c0_23 = arith.constant 0 : index
    %31 = vector.load %arg9[%c0_22, %c0_23] : memref<64x256xf32, #tpu.memory_space<vmem>>, vector<64x256xf32>
    %cst_24 = arith.constant dense<0.000000e+00> : vector<8x256xf32>
    %32 = tpu.matmul %28, %31, %cst_24 {dimension_numbers = #tpu.dot_dimension_numbers<[1], [0], [0], [1], [0, 0, 1, 1], [], []>} : vector<8x64xf32>, vector<64x256xf32>, vector<8x256xf32> -> vector<8x256xf32>
    %c0_25 = arith.constant 0 : index
    %c0_26 = arith.constant 0 : index
    %33 = vector.load %arg10[%c0_25, %c0_26] : memref<64x256xf32, #tpu.memory_space<vmem>>, vector<64x256xf32>
    %cst_27 = arith.constant dense<0.000000e+00> : vector<8x256xf32>
    %34 = tpu.matmul %29, %33, %cst_27 {dimension_numbers = #tpu.dot_dimension_numbers<[1], [0], [0], [1], [0, 0, 1, 1], [], []>} : vector<8x64xf32>, vector<64x256xf32>, vector<8x256xf32> -> vector<8x256xf32>
    %35 = arith.addf %32, %34 : vector<8x256xf32>
    %c0_28 = arith.constant 0 : index
    %c0_29 = arith.constant 0 : index
    %36 = vector.load %arg11[%c0_28, %c0_29] : memref<1x256xf32, #tpu.memory_space<vmem>>, vector<1x256xf32>
    %37 = vector.broadcast %36 : vector<1x256xf32> to vector<8x256xf32>
    %38 = arith.addf %35, %37 : vector<8x256xf32>
    %39 = vector.extract_strided_slice %38 {offsets = [0, 0], sizes = [8, 64], strides = [1, 1]} : vector<8x256xf32> to vector<8x64xf32>
    %cst_30 = arith.constant 5.000000e-01 : f32
    %40 = vector.broadcast %cst_30 : f32 to vector<8x64xf32>
    %41 = arith.mulf %40, %39 : vector<8x64xf32>
    %42 = math.tanh %41 : vector<8x64xf32>
    %cst_31 = arith.constant 5.000000e-01 : f32
    %43 = vector.broadcast %cst_31 : f32 to vector<8x64xf32>
    %44 = arith.mulf %43, %42 : vector<8x64xf32>
    %cst_32 = arith.constant 5.000000e-01 : f32
    %45 = vector.broadcast %cst_32 : f32 to vector<8x64xf32>
    %46 = arith.addf %44, %45 : vector<8x64xf32>
    %47 = vector.extract_strided_slice %38 {offsets = [0, 64], sizes = [8, 64], strides = [1, 1]} : vector<8x256xf32> to vector<8x64xf32>
    %cst_33 = arith.constant 5.000000e-01 : f32
    %48 = vector.broadcast %cst_33 : f32 to vector<8x64xf32>
    %49 = arith.mulf %48, %47 : vector<8x64xf32>
    %50 = math.tanh %49 : vector<8x64xf32>
    %cst_34 = arith.constant 5.000000e-01 : f32
    %51 = vector.broadcast %cst_34 : f32 to vector<8x64xf32>
    %52 = arith.mulf %51, %50 : vector<8x64xf32>
    %cst_35 = arith.constant 5.000000e-01 : f32
    %53 = vector.broadcast %cst_35 : f32 to vector<8x64xf32>
    %54 = arith.addf %52, %53 : vector<8x64xf32>
    %55 = vector.extract_strided_slice %38 {offsets = [0, 128], sizes = [8, 64], strides = [1, 1]} : vector<8x256xf32> to vector<8x64xf32>
    %56 = math.tanh %55 : vector<8x64xf32>
    %57 = vector.extract_strided_slice %38 {offsets = [0, 192], sizes = [8, 64], strides = [1, 1]} : vector<8x256xf32> to vector<8x64xf32>
    %cst_36 = arith.constant 5.000000e-01 : f32
    %58 = vector.broadcast %cst_36 : f32 to vector<8x64xf32>
    %59 = arith.mulf %58, %57 : vector<8x64xf32>
    %60 = math.tanh %59 : vector<8x64xf32>
    %cst_37 = arith.constant 5.000000e-01 : f32
    %61 = vector.broadcast %cst_37 : f32 to vector<8x64xf32>
    %62 = arith.mulf %61, %60 : vector<8x64xf32>
    %cst_38 = arith.constant 5.000000e-01 : f32
    %63 = vector.broadcast %cst_38 : f32 to vector<8x64xf32>
    %64 = arith.addf %62, %63 : vector<8x64xf32>
    %65 = arith.mulf %54, %30 : vector<8x64xf32>
    %66 = arith.mulf %46, %56 : vector<8x64xf32>
    %67 = arith.addf %65, %66 : vector<8x64xf32>
    %68 = math.tanh %67 : vector<8x64xf32>
    %69 = arith.mulf %64, %68 : vector<8x64xf32>
    %c0_39 = arith.constant 0 : index
    %c0_40 = arith.constant 0 : index
    %70 = vector.load %arg18[%c0_39, %c0_40] : memref<8x128xf32, #tpu.memory_space<vmem>>, vector<8x64xf32>
    tpu.vector_store %arg18[%c0_39, %c0_40], %69 {strides = array<i32>} : memref<8x128xf32, #tpu.memory_space<vmem>>, vector<8x64xf32>,
    %c0_41 = arith.constant 0 : index
    %c64 = arith.constant 64 : index
    %71 = vector.load %arg18[%c0_41, %c64] : memref<8x128xf32, #tpu.memory_space<vmem>>, vector<8x64xf32>
    tpu.vector_store %arg18[%c0_41, %c64], %67 {strides = array<i32>} : memref<8x128xf32, #tpu.memory_space<vmem>>, vector<8x64xf32>,
    %c0_42 = arith.constant 0 : index
    %c0_43 = arith.constant 0 : index
    %72 = vector.load %arg12[%c0_42, %c0_43] : memref<64x128xf32, #tpu.memory_space<vmem>>, vector<64x128xf32>
    %cst_44 = arith.constant dense<0.000000e+00> : vector<8x128xf32>
    %73 = tpu.matmul %69, %72, %cst_44 {dimension_numbers = #tpu.dot_dimension_numbers<[1], [0], [0], [1], [0, 0, 1, 1], [], []>} : vector<8x64xf32>, vector<64x128xf32>, vector<8x128xf32> -> vector<8x128xf32>
    %c0_45 = arith.constant 0 : index
    %c0_46 = arith.constant 0 : index
    %74 = vector.load %arg13[%c0_45, %c0_46] : memref<1x128xf32, #tpu.memory_space<vmem>>, vector<1x128xf32>
    %75 = vector.broadcast %74 : vector<1x128xf32> to vector<8x128xf32>
    %76 = arith.addf %73, %75 : vector<8x128xf32>
    %77 = math.tanh %76 : vector<8x128xf32>
    %c0_47 = arith.constant 0 : index
    %c0_48 = arith.constant 0 : index
    %78 = vector.load %arg14[%c0_47, %c0_48] : memref<128x8xf32, #tpu.memory_space<vmem>>, vector<128x8xf32>
    %cst_49 = arith.constant dense<0.000000e+00> : vector<8x8xf32>
    %79 = tpu.matmul %77, %78, %cst_49 {dimension_numbers = #tpu.dot_dimension_numbers<[1], [0], [0], [1], [0, 0, 1, 1], [], []>} : vector<8x128xf32>, vector<128x8xf32>, vector<8x8xf32> -> vector<8x8xf32>
    %c0_50 = arith.constant 0 : index
    %c0_51 = arith.constant 0 : index
    %80 = vector.load %arg15[%c0_50, %c0_51] : memref<1x8xf32, #tpu.memory_space<vmem>>, vector<1x8xf32>
    %81 = vector.broadcast %80 : vector<1x8xf32> to vector<8x8xf32>
    %82 = arith.addf %79, %81 : vector<8x8xf32>
    %83 = vector.extract_strided_slice %82 {offsets = [0, 0], sizes = [8, 7], strides = [1, 1]} : vector<8x8xf32> to vector<8x7xf32>
    %cst_52 = arith.constant dense<0xFF800000> : vector<8xf32>
    %84 = vector.multi_reduction <maximumf>, %83, %cst_52 [1] : vector<8x7xf32> to vector<8xf32>
    %85 = vector.shape_cast %84 : vector<8xf32> to vector<8x1xf32>
    %86 = vector.broadcast %85 : vector<8x1xf32> to vector<8x7xf32>
    %87 = arith.subf %83, %86 : vector<8x7xf32>
    %88 = math.exp %87 : vector<8x7xf32>
    %cst_53 = arith.constant dense<0.000000e+00> : vector<8xf32>
    %89 = vector.multi_reduction <add>, %88, %cst_53 [1] : vector<8x7xf32> to vector<8xf32>
    %90 = vector.shape_cast %89 : vector<8xf32> to vector<8x1xf32>
    %91 = math.log %90 : vector<8x1xf32>
    %92 = arith.addf %85, %91 : vector<8x1xf32>
    %93 = vector.broadcast %92 : vector<8x1xf32> to vector<8x7xf32>
    %94 = arith.subf %83, %93 : vector<8x7xf32>
    %c0_54 = arith.constant 0 : index
    %c0_55 = arith.constant 0 : index
    %95 = vector.load %arg16[%c0_54, %c0_55] : memref<8x7xf32, #tpu.memory_space<vmem>>, vector<8x7xf32>
    tpu.vector_store %arg16[%c0_54, %c0_55], %94 {strides = array<i32>} : memref<8x7xf32, #tpu.memory_space<vmem>>, vector<8x7xf32>,
    %96 = vector.extract_strided_slice %82 {offsets = [0, 7], sizes = [8, 1], strides = [1, 1]} : vector<8x8xf32> to vector<8x1xf32>
    %c0_56 = arith.constant 0 : index
    %c0_57 = arith.constant 0 : index
    %97 = vector.load %arg17[%c0_56, %c0_57] : memref<8x1xf32, #tpu.memory_space<vmem>>, vector<8x1xf32>
    tpu.vector_store %arg17[%c0_56, %c0_57], %96 {strides = array<i32>} : memref<8x1xf32, #tpu.memory_space<vmem>>, vector<8x1xf32>,
    return
  }
}

</mosaic_0001>

<bundles_post_ra>
// kernel: acmodel_forward.1
= control target key start
LH: loop header
LB: loop body
LE: loop exit
PB: predicated region body
PF: predicated region fallthrough
CT: control target
= control target key end

     0   :  { %vm124_vm0 = vcmask 523264   ;;  %vm1255_vm1 = vmmov 0   ;;  %vm667_vm2 = vcmask 1048064   ;;  %vm850_vm3 = vcmask 56320   ;;  %s1924_s3 = inlined_call_operand.vmem [shape: f32[192,256], index: 3, kind: input, shape index: {}]   ;;  %s1925_s0 = inlined_call_operand.vmem [shape: f32[32,192], index: 0, kind: input, shape index: {}]   ;;  %s1926_s5 = inlined_call_operand.vmem [shape: f32[256,128], index: 5, kind: input, shape index: {}]   ;;  %s1927_s4 = inlined_call_operand.vmem [shape: f32[1,256], index: 4, kind: input, shape index: {}]   ;;  %s1928_s7 = inlined_call_operand.vmem [shape: f32[128,64], index: 7, kind: input, shape index: {}]   ;;  %s1929_s10 = inlined_call_operand.vmem [shape: f32[64,256], index: 10, kind: input, shape index: {}]   ;;  %s1930_s9 = inlined_call_operand.vmem [shape: f32[64,256], index: 9, kind: input, shape index: {}]   ;;  %s1931_s6 = inlined_call_operand.vmem [shape: f32[1,128], index: 6, kind: input, shape index: {}]   ;;  %s1932_s1 = inlined_call_operand.vmem [shape: f32[8,64], index: 1, kind: input, shape index: {}]   ;;  %s1933_s2 = inlined_call_operand.vmem [shape: f32[8,64], index: 2, kind: input, shape index: {}]   ;;  %s1934_s8 = inlined_call_operand.vmem [shape: f32[1,64], index: 8, kind: input, shape index: {}]   ;;  %s1935_s11 = inlined_call_operand.vmem [shape: f32[1,256], index: 11, kind: input, shape index: {}]   ;;  %s1936_s12 = inlined_call_operand.vmem [shape: f32[64,128], index: 12, kind: input, shape index: {}]   ;;  %s1937_s14 = inlined_call_operand.vmem [shape: f32[128,8], index: 14, kind: input, shape index: {}]   ;;  %s1938_s18 = inlined_call_operand.vmem [shape: f32[8,128], index: 18, kind: output, shape index: {2}]   ;;  %s1939_s13 = inlined_call_operand.vmem [shape: f32[1,128], index: 13, kind: input, shape index: {}]   ;;  %s1940_s15 = inlined_call_operand.vmem [shape: f32[1,8], index: 15, kind: input, shape index: {}]   ;;  %s1941_s17 = inlined_call_operand.vmem [shape: f32[8,1], index: 17, kind: output, shape index: {1}]   ;;  %s1942_s16 = inlined_call_operand.vmem [shape: f32[8,7], index: 16, kind: output, shape index: {0}]  }
   0x1   :  { %1946 = sst [smem:[#allocation2_spill]] %s1924_s3  ;;  %vm869_vm4 = vcmask 7168  }
   0x2   :  { %1947 = sst [smem:[#allocation3_spill]] %s1925_s0  ;;  %s1949_s29 = sld [smem:[#allocation2_spill]] }
   0x3   :  { %1948 = sst [smem:[#allocation4_spill]] %s1926_s5  ;;  %s1950_s19 = sld [smem:[#allocation3_spill]] }
   0x4   :  { %s1951_s28 = sld [smem:[#allocation4_spill]] }
   0x8   :  { %v65_v0 = vld [vmem:[%s1949_s29 + $0x8] sm:$0xff]  ;;  %v67_v1 = vld [vmem:[%s1949_s29 + $0x18] sm:$0xff]  ;;  %v64_v2 = vld [vmem:[%s1949_s29] sm:$0xff] }
   0x9   :  { %v1061_v3 = vpack.c.bf16 %v67_v1, %v65_v0  ;;  %v66_v4 = vld [vmem:[%s1949_s29 + $0x10] sm:$0xff]  ;;  %v69_v5 = vld [vmem:[%s1949_s29 + $0x28] sm:$0xff]  ;;  %v71_v6 = vld [vmem:[%s1949_s29 + $0x38] sm:$0xff] }
   0xa   :  { %v1063_v7 = vpack.c.bf16 %v66_v4, %v64_v2  ;;  %v1065_v8 = vpack.c.bf16 %v71_v6, %v69_v5  ;;  %v68_v9 = vld [vmem:[%s1949_s29 + $0x20] sm:$0xff]  ;;  %v70_v10 = vld [vmem:[%s1949_s29 + $0x30] sm:$0xff]  ;;  %v73_v11 = vld [vmem:[%s1949_s29 + $0x48] sm:$0xff] }
   0xb   :  { %1062 = vmatprep.subr.bf16.mxu0 %v1061_v3  ;;  %v75_v12 = vld [vmem:[%s1949_s29 + $0x58] sm:$0xff]  ;;  %v1067_v13 = vpack.c.bf16 %v70_v10, %v68_v9  ;;  %v72_v15 = vld [vmem:[%s1949_s29 + $0x40] sm:$0xff]  ;;  %v74_v16 = vld [vmem:[%s1949_s29 + $0x50] sm:$0xff] }
   0xc   :  { %1064 = vmatpush1.bf16.msra.mxu0 %v1063_v7  ;;  %v1069_v14 = vpack.c.bf16 %v75_v12, %v73_v11  ;;  %v77_v17 = vld [vmem:[%s1949_s29 + $0x68] sm:$0xff]  ;;  %v79_v18 = vld [vmem:[%s1949_s29 + $0x78] sm:$0xff]  ;;  %v1071_v19 = vpack.c.bf16 %v74_v16, %v72_v15  ;;  %v76_v21 = vld [vmem:[%s1949_s29 + $0x60] sm:$0xff] }
   0xd   :  { %1066 = vmatprep.subr.bf16.mxu0 %v1065_v8  ;;  %v1073_v20 = vpack.c.bf16 %v79_v18, %v77_v17  ;;  %v78_v22 = vld [vmem:[%s1949_s29 + $0x70] sm:$0xff]  ;;  %v81_v23 = vld [vmem:[%s1949_s29 + $0x88] sm:$0xff]  ;;  %v83_v24 = vld [vmem:[%s1949_s29 + $0x98] sm:$0xff] }
   0xe   :  { %v1075_v25 = vpack.c.bf16 %v78_v22, %v76_v21  ;;  %v1077_v26 = vpack.c.bf16 %v83_v24, %v81_v23  ;;  %v80_v27 = vld [vmem:[%s1949_s29 + $0x80] sm:$0xff]  ;;  %v82_v28 = vld [vmem:[%s1949_s29 + $0x90] sm:$0xff]  ;;  %v85_v29 = vld [vmem:[%s1949_s29 + $0xa8] sm:$0xff] }
   0xf   :  { %v87_v30 = vld [vmem:[%s1949_s29 + $0xb8] sm:$0xff]  ;;  %v1079_v31 = vpack.c.bf16 %v82_v28, %v80_v27  ;;  %v57_v32 = vld [vmem:[%s1950_s19 + $0x8] sm:$0xff]  ;;  %v84_v34 = vld [vmem:[%s1949_s29 + $0xa0] sm:$0xff] }
  0x10   :  { %1068 = vmatpush1.bf16.msra.mxu0 %v1067_v13  ;;  %v1081_v33 = vpack.c.bf16 %v87_v30, %v85_v29  ;;  %v86_v35 = vld [vmem:[%s1949_s29 + $0xb0] sm:$0xff]  ;;  %883 = vmatprep.mubr.msk.f32.mxu0 %vm124_vm0, %v57_v32  ;;  %v89_v36 = vld [vmem:[%s1949_s29 + $0xc8] sm:$0xff]  ;;  %v91_v37 = vld [vmem:[%s1949_s29 + $0xd8] sm:$0xff] }
  0x11   :  { %1070 = vmatprep.subr.bf16.mxu0 %v1069_v14  ;;  %v256_v38 = vld [vmem:[%s1951_s28 + $0x80] sm:$0xff]  ;;  %v90_v40 = vld [vmem:[%s1949_s29 + $0xd0] sm:$0xff]  ;;  %v257_v41 = vld [vmem:[%s1951_s28 + $0x88] sm:$0xff]  ;;  %v1083_v44 = vpack.c.bf16 %v86_v35, %v84_v34  ;;  %v1085_v50 = vpack.c.bf16 %v91_v37, %v89_v36 }
  0x12   :  { %v88_v39 = vld [vmem:[%s1949_s29 + $0xc0] sm:$0xff]  ;;  %v241_v43 = vld [vmem:[%s1951_s28 + $0x8] sm:$0xff]  ;;  %v1109_v45 = vpack.c.bf16 %v257_v41, %v256_v38  ;;  %v258_v47 = vld [vmem:[%s1951_s28 + $0x90] sm:$0xff] }
  0x13   :  { %v240_v42 = vld [vmem:[%s1951_s28] sm:$0xff]  ;;  %v259_v48 = vld [vmem:[%s1951_s28 + $0x98] sm:$0xff]  ;;  %v242_v49 = vld [vmem:[%s1951_s28 + $0x10] sm:$0xff]  ;;  %v1087_v58 = vpack.c.bf16 %v90_v40, %v88_v39 }
  0x14   :  { %1072 = vmatpush1.bf16.msra.mxu0 %v1071_v19  ;;  %v1111_v46 = vpack.c.bf16 %v241_v43, %v240_v42  ;;  %v1113_v51 = vpack.c.bf16 %v259_v48, %v258_v47  ;;  %v243_v52 = vld [vmem:[%s1951_s28 + $0x18] sm:$0xff]  ;;  %v260_v53 = vld [vmem:[%s1951_s28 + $0xa0] sm:$0xff]  ;;  %v261_v54 = vld [vmem:[%s1951_s28 + $0xa8] sm:$0xff]  ;;  %1110 = vmatprep.subr.bf16.mxu1 %v1109_v45 }
  0x15   :  { %1074 = vmatprep.subr.bf16.mxu0 %v1073_v20  ;;  %v93_v55 = vld [vmem:[%s1949_s29 + $0xe8] sm:$0xff]  ;;  %v95_v56 = vld [vmem:[%s1949_s29 + $0xf8] sm:$0xff]  ;;  %v1115_v57 = vpack.c.bf16 %v243_v52, %v242_v49  ;;  %v1117_v59 = vpack.c.bf16 %v261_v54, %v260_v53  ;;  %v92_v61 = vld [vmem:[%s1949_s29 + $0xe0] sm:$0xff] }
  0x16   :  { %1112 = vmatpush3.bf16.msra.mxu1 %v1111_v46  ;;  %v1089_v60 = vpack.c.bf16 %v95_v56, %v93_v55  ;;  %v94_v62 = vld [vmem:[%s1949_s29 + $0xf0] sm:$0xff]  ;;  %v97_v63 = vld [vmem:[%s1949_s29 + $0x108] sm:$0xff]  ;;  %v99_v0 = vld [vmem:[%s1949_s29 + $0x118] sm:$0xff] }
  0x17   :  { %1114 = vmatprep.subr.bf16.mxu1 %v1113_v51  ;;  %v1091_v1 = vpack.c.bf16 %v94_v62, %v92_v61  ;;  %v1093_v2 = vpack.c.bf16 %v99_v0, %v97_v63  ;;  %v96_v3 = vld [vmem:[%s1949_s29 + $0x100] sm:$0xff]  ;;  %v98_v4 = vld [vmem:[%s1949_s29 + $0x110] sm:$0xff]  ;;  %v101_v5 = vld [vmem:[%s1949_s29 + $0x128] sm:$0xff]  ;;  %v1254_v0 = vmov 0.0|0.0  }
  0x18   :  { %1076 = vmatpush1.bf16.msra.mxu0 %v1075_v25  ;;  %v103_v6 = vld [vmem:[%s1949_s29 + $0x138] sm:$0xff]  ;;  %v1095_v7 = vpack.c.bf16 %v98_v4, %v96_v3  ;;  %v100_v9 = vld [vmem:[%s1949_s29 + $0x120] sm:$0xff]  ;;  %v102_v10 = vld [vmem:[%s1949_s29 + $0x130] sm:$0xff] }
  0x19   :  { %1078 = vmatprep.subr.bf16.mxu0 %v1077_v26  ;;  %v1097_v8 = vpack.c.bf16 %v103_v6, %v101_v5  ;;  %v105_v11 = vld [vmem:[%s1949_s29 + $0x148] sm:$0xff]  ;;  %v107_v12 = vld [vmem:[%s1949_s29 + $0x158] sm:$0xff]  ;;  %v1099_v13 = vpack.c.bf16 %v102_v10, %v100_v9  ;;  %v104_v15 = vld [vmem:[%s1949_s29 + $0x140] sm:$0xff] }
  0x1a   :  { %1116 = vmatpush3.bf16.msra.mxu1 %v1115_v57  ;;  %v1101_v14 = vpack.c.bf16 %v107_v12, %v105_v11  ;;  %v106_v16 = vld [vmem:[%s1949_s29 + $0x150] sm:$0xff]  ;;  %v109_v17 = vld [vmem:[%s1949_s29 + $0x168] sm:$0xff]  ;;  %v111_v18 = vld [vmem:[%s1949_s29 + $0x178] sm:$0xff] }
  0x1b   :  { %1118 = vmatprep.subr.bf16.mxu1 %v1117_v59  ;;  %v1103_v19 = vpack.c.bf16 %v106_v16, %v104_v15  ;;  %v1105_v20 = vpack.c.bf16 %v111_v18, %v109_v17  ;;  %v108_v21 = vld [vmem:[%s1949_s29 + $0x160] sm:$0xff]  ;;  %v110_v22 = vld [vmem:[%s1949_s29 + $0x170] sm:$0xff]  ;;  %v59_v25 = vld [vmem:[%s1950_s19 + $0x18] sm:$0xff] }
  0x1c   :  { %1080 = vmatpush1.bf16.msra.mxu0 %v1079_v31  ;;  %v1107_v23 = vpack.c.bf16 %v110_v22, %v108_v21  ;;  %v56_v24 = vld [vmem:[%s1950_s19] sm:$0xff]  ;;  %v58_v26 = vld [vmem:[%s1950_s19 + $0x10] sm:$0xff]  ;;  %v61_v27 = vld [vmem:[%s1950_s19 + $0x28] sm:$0xff] }
  0x1d   :  { %1082 = vmatprep.subr.bf16.mxu0 %v1081_v33  ;;  %v60_v28 = vld [vmem:[%s1950_s19 + $0x20] sm:$0xff]  ;;  %v63_v29 = vld [vmem:[%s1950_s19 + $0x38] sm:$0xff]  ;;  %v62_v30 = vld [vmem:[%s1950_s19 + $0x30] sm:$0xff] }
  0x1e   :  { %v244_v31 = vld [vmem:[%s1951_s28 + $0x20] sm:$0xff]  ;;  %v245_v32 = vld [vmem:[%s1951_s28 + $0x28] sm:$0xff]  ;;  %v262_v34 = vld [vmem:[%s1951_s28 + $0xb0] sm:$0xff] }
  0x1f   :  { %v1119_v33 = vpack.c.bf16 %v245_v32, %v244_v31  ;;  %v263_v35 = vld [vmem:[%s1951_s28 + $0xb8] sm:$0xff]  ;;  %v246_v37 = vld [vmem:[%s1951_s28 + $0x30] sm:$0xff]  ;;  %v264_v40 = vld [vmem:[%s1951_s28 + $0xc0] sm:$0xff] }
  0x20   :  { %1084 = vmatpush1.bf16.msra.mxu0 %v1083_v44  ;;  %v1121_v36 = vpack.c.bf16 %v263_v35, %v262_v34  ;;  %v247_v38 = vld [vmem:[%s1951_s28 + $0x38] sm:$0xff]  ;;  %v265_v41 = vld [vmem:[%s1951_s28 + $0xc8] sm:$0xff]  ;;  %v248_v43 = vld [vmem:[%s1951_s28 + $0x40] sm:$0xff] }
  0x21   :  { %1086 = vmatprep.subr.bf16.mxu0 %v1085_v50  ;;  %1120 = vmatpush3.bf16.msra.mxu1 %v1119_v33  ;;  %v1123_v39 = vpack.c.bf16 %v247_v38, %v246_v37  ;;  %v1125_v42 = vpack.c.bf16 %v265_v41, %v264_v40  ;;  %v249_v44 = vld [vmem:[%s1951_s28 + $0x48] sm:$0xff]  ;;  %v266_v46 = vld [vmem:[%s1951_s28 + $0xd0] sm:$0xff]  ;;  %v267_v47 = vld [vmem:[%s1951_s28 + $0xd8] sm:$0xff] }
  0x22   :  { %1122 = vmatprep.subr.bf16.mxu1 %v1121_v36  ;;  %v1127_v45 = vpack.c.bf16 %v249_v44, %v248_v43  ;;  %v1129_v48 = vpack.c.bf16 %v267_v47, %v266_v46  ;;  %v250_v49 = vld [vmem:[%s1951_s28 + $0x50] sm:$0xff]  ;;  %v251_v50 = vld [vmem:[%s1951_s28 + $0x58] sm:$0xff]  ;;  %v268_v52 = vld [vmem:[%s1951_s28 + $0xe0] sm:$0xff] }
  0x23   :  { %v1131_v51 = vpack.c.bf16 %v251_v50, %v250_v49  ;;  %v269_v53 = vld [vmem:[%s1951_s28 + $0xe8] sm:$0xff]  ;;  %v252_v55 = vld [vmem:[%s1951_s28 + $0x60] sm:$0xff]  ;;  %v271_v59 = vld [vmem:[%s1951_s28 + $0xf8] sm:$0xff] }
  0x24   :  { %1088 = vmatpush1.bf16.msra.mxu0 %v1087_v58  ;;  %v1133_v54 = vpack.c.bf16 %v269_v53, %v268_v52  ;;  %v253_v56 = vld [vmem:[%s1951_s28 + $0x68] sm:$0xff]  ;;  %v270_v58 = vld [vmem:[%s1951_s28 + $0xf0] sm:$0xff]  ;;  %v255_v62 = vld [vmem:[%s1951_s28 + $0x78] sm:$0xff] }
  0x25   :  { %1090 = vmatprep.subr.bf16.mxu0 %v1089_v60  ;;  %1124 = vmatpush3.bf16.msra.mxu1 %v1123_v39  ;;  %v1135_v57 = vpack.c.bf16 %v253_v56, %v252_v55  ;;  %v1137_v60 = vpack.c.bf16 %v271_v59, %v270_v58  ;;  %v254_v61 = vld [vmem:[%s1951_s28 + $0x70] sm:$0xff]  ;;  %v112_v4 = vld [vmem:[%s1927_s4] sm:$0x3]  ;;  %v351_v36 = vld [vmem:[%s1928_s7 + $0x8] sm:$0xff] }
  0x26   :  { %1126 = vmatprep.subr.bf16.mxu1 %v1125_v42  ;;  %v1139_v63 = vpack.c.bf16 %v255_v62, %v254_v61  ;;  %v350_v35 = vld [vmem:[%s1928_s7] sm:$0xff]  ;;  %v352_v41 = vld [vmem:[%s1928_s7 + $0x10] sm:$0xff]  ;;  %v353_v42 = vld [vmem:[%s1928_s7 + $0x18] sm:$0xff]  ;;  %v1256_v62 = vmov 0.0  }
  0x27   :  { %v1142_v40 = vpack.c.bf16 %v351_v36, %v350_v35  ;;  %v1145_v43 = vpack.c.bf16 %v353_v42, %v352_v41  ;;  %v354_v44 = vld [vmem:[%s1928_s7 + $0x20] sm:$0xff]  ;;  %v356_v47 = vld [vmem:[%s1928_s7 + $0x30] sm:$0xff] }
  0x28   :  { %1092 = vmatpush1.bf16.msra.mxu0 %v1091_v1  ;;  %v114_v1 = vlaneseq  ;;  %v358_v50 = vld [vmem:[%s1928_s7 + $0x40] sm:$0xff]  ;;  %v360_v53 = vld [vmem:[%s1928_s7 + $0x50] sm:$0xff] }
  0x29   :  { %1094 = vmatprep.subr.bf16.mxu0 %v1093_v2  ;;  %1128 = vmatpush3.bf16.msra.mxu1 %v1127_v45  ;;  %v355_v45 = vld [vmem:[%s1928_s7 + $0x28] sm:$0xff]  ;;  %v362_v56 = vld [vmem:[%s1928_s7 + $0x60] sm:$0xff]  ;;  %v364_v59 = vld [vmem:[%s1928_s7 + $0x70] sm:$0xff] }
  0x2a   :  { %1130 = vmatprep.subr.bf16.mxu1 %v1129_v48  ;;  %v1623_v2 = vshrl.u32 %v114_v1, 7  ;;  %v1148_v46 = vpack.c.bf16 %v355_v45, %v354_v44  ;;  %v357_v48 = vld [vmem:[%s1928_s7 + $0x38] sm:$0xff]  ;;  %v466_v36 = vld [vmem:[%s1929_s10 + $0x20] sm:$0xff]  ;;  %v475_v45 = vld [vmem:[%s1929_s10 + $0x68] sm:$0xff] }
  0x2b   :  { %v1151_v49 = vpack.c.bf16 %v357_v48, %v356_v47  ;;  %v465_v1 = vld [vmem:[%s1929_s10 + $0x18] sm:$0xff]  ;;  %v470_v42 = vld [vmem:[%s1929_s10 + $0x40] sm:$0xff]  ;;  %v459_v48 = vld [vmem:[%s1930_s9 + $0x68] sm:$0xff] }
  0x2c   :  { %1096 = vmatpush1.bf16.msra.mxu0 %v1095_v7  ;;  %v116_v3 = vsub.s32 0, %v1623_v2  ;;  %v120_v5 = vsub.s32 1, %v1623_v2  ;;  %v670_v2 = vld [vmem:[%s1936_s12 + $0x8] sm:$0xff] }
  0x2d   :  { %1098 = vmatprep.subr.bf16.mxu0 %v1097_v8  ;;  %1132 = vmatpush3.bf16.msra.mxu1 %v1131_v51  ;;  %v359_v51 = vld [vmem:[%s1928_s7 + $0x48] sm:$0xff] }
  0x2e   :  { %1134 = vmatprep.subr.bf16.mxu1 %v1133_v54  ;;  %v117_v6 = vrot.slane %v112_v4, %v116_v3  ;;  %v121_v8 = vrot.slane %v112_v4, %v120_v5  ;;  %v1154_v52 = vpack.c.bf16 %v359_v51, %v358_v50  ;;  %v361_v54 = vld [vmem:[%s1928_s7 + $0x58] sm:$0xff]  ;;  %v447_v4 = vld [vmem:[%s1930_s9 + $0x8] sm:$0xff]  ;;  %v474_v50 = vld [vmem:[%s1929_s10 + $0x60] sm:$0xff] }
  0x2f   :  { %v1157_v55 = vpack.c.bf16 %v361_v54, %v360_v53  ;;  %v458_v53 = vld [vmem:[%s1930_s9 + $0x60] sm:$0xff]  ;;  %v460_v54 = vld [vmem:[%s1930_s9 + $0x70] sm:$0xff] }
  0x30   :  { %1100 = vmatpush1.bf16.msra.mxu0 %v1099_v13 }
  0x31   :  { %1102 = vmatprep.subr.bf16.mxu0 %v1101_v14  ;;  %1136 = vmatpush3.bf16.msra.mxu1 %v1135_v57  ;;  %v363_v57 = vld [vmem:[%s1928_s7 + $0x68] sm:$0xff] }
  0x32   :  { %1138 = vmatprep.subr.bf16.mxu1 %v1137_v60  ;;  %v1160_v58 = vpack.c.bf16 %v363_v57, %v362_v56  ;;  %v365_v60 = vld [vmem:[%s1928_s7 + $0x78] sm:$0xff]  ;;  %v1195_v56 = vpack.c.bf16 %v460_v54, %v458_v53  ;;  %v444_v57 = vld [vmem:[%s1932_s1] sm:$0xff]  ;;  %v766_v53 = vld [vmem:[%s1937_s14 + $0x48] sm:$0xff] }
  0x33   :  { %v1163_v61 = vpack.c.bf16 %v365_v60, %v364_v59  ;;  %v888_v59 = vld [vmem:[%s1934_s8] ss:$0 sm:$0xff] }
  0x34   :  { %1104 = vmatpush1.bf16.msra.mxu0 %v1103_v19 }
  0x35   :  { %1106 = vmatprep.subr.bf16.mxu0 %v1105_v20  ;;  %1140 = vmatpush3.bf16.msra.mxu1 %v1139_v63  ;;  %v463_v63 = vld [vmem:[%s1929_s10 + $0x8] sm:$0xff] }
  0x36   :  { %1141 = vmatprep.subr.bf16.mxu1 %v1254_v0 }
  0x38   :  { %1108 = vmatpush1.bf16.msra.mxu0 %v1107_v23 }
  0x3b   :  { %202 = vmatmul.mubr.f32.vlgmr.msra.gmra.mrb[0].mxu0 %v56_v24 }
  0x3c   :  { %884 = vmatprep.mubr.msk.f32.mxu0 %vm124_vm0, %v59_v25 }
  0x3f   :  { %208 = vmatmul.mubr.f32.gmra.mrb[2].mxu0 %v58_v26 }
  0x40   :  { %885 = vmatprep.mubr.msk.f32.mxu0 %vm124_vm0, %v61_v27 }
  0x43   :  { %214 = vmatmul.mubr.f32.gmra.mrb[4].mxu0 %v60_v28 }
  0x44   :  { %886 = vmatprep.mubr.msk.f32.mxu0 %vm124_vm0, %v63_v29 }
  0x47   :  { %220 = vmatmul.mubr.f32.gmra.mrb[6].mxu0 %v62_v30 }
  0x48   :  { %619 = vmatprep.mubr.f32.mxu0 %v1256_v62 }
 0x10e   :  { %v203_v7 = vpop.f32.mrb[0].mxu0 }
 0x10f   :  { %v205_v9 = vpop.f32.mrb[1].mxu0  ;;  %v204_v10 = vadd.f32 %v203_v7, %v117_v6  ;;  %v449_v7 = vld [vmem:[%s1930_s9 + $0x18] sm:$0xff] }
 0x110   :  { %v206_v11 = vadd.f32 %v205_v9, %v121_v8  ;;  %v446_v9 = vld [vmem:[%s1930_s9] sm:$0xff] }
 0x111   :  { %v226_v16 = vmax.f32 %v204_v10, 0.0  ;;  %v448_v10 = vld [vmem:[%s1930_s9 + $0x10] sm:$0xff] }
 0x112   :  { %v209_v12 = vpop.f32.mrb[2].mxu0  ;;  %v227_v18 = vmax.f32 %v206_v11, 0.0  ;;  %v1183_v11 = vpack.c.bf16 %v448_v10, %v446_v9 }
 0x113   :  { %v210_v13 = vadd.f32 %v209_v12, %v117_v6  ;;  %v211_v14 = vpop.f32.mrb[3].mxu0  ;;  %v451_v12 = vld [vmem:[%s1930_s9 + $0x28] sm:$0xff] }
 0x114   :  { %v212_v15 = vadd.f32 %v211_v14, %v121_v8 }
 0x115   :  { %v228_v17 = vmax.f32 %v210_v13, 0.0  ;;  %v453_v13 = vld [vmem:[%s1930_s9 + $0x38] sm:$0xff] }
 0x116   :  { %v229_v19 = vmax.f32 %v212_v15, 0.0  ;;  %v215_v20 = vpop.f32.mrb[4].mxu0  ;;  %v1185_v14 = vpack.c.bf16 %v453_v13, %v451_v12  ;;  %v450_v15 = vld [vmem:[%s1930_s9 + $0x20] sm:$0xff] }
 0x117   :  { %v234_v21 = vmax.f32 %v226_v16, %v228_v17  ;;  %v217_v22 = vpop.f32.mrb[5].mxu0  ;;  %v216_v24 = vadd.f32 %v215_v20, %v117_v6  ;;  %v452_v16 = vld [vmem:[%s1930_s9 + $0x30] sm:$0xff] }
 0x118   :  { %v235_v23 = vmax.f32 %v227_v18, %v229_v19  ;;  %v218_v25 = vadd.f32 %v217_v22, %v121_v8  ;;  %v1187_v17 = vpack.c.bf16 %v452_v16, %v450_v15  ;;  %v455_v18 = vld [vmem:[%s1930_s9 + $0x48] sm:$0xff]  ;;  %v457_v19 = vld [vmem:[%s1930_s9 + $0x58] sm:$0xff]  ;;  %v456_v22 = vld [vmem:[%s1930_s9 + $0x50] sm:$0xff] }
 0x119   :  { %v230_v30 = vmax.f32 %v216_v24, 0.0  ;;  %v1189_v20 = vpack.c.bf16 %v457_v19, %v455_v18 }
 0x11a   :  { %v221_v26 = vpop.f32.mrb[6].mxu0  ;;  %v231_v32 = vmax.f32 %v218_v25, 0.0  ;;  %v887_v25 = vld [vmem:[%s1931_s6] ss:$0 sm:$0xff] }
 0x11b   :  { %v222_v27 = vadd.f32 %v221_v26, %v117_v6  ;;  %v223_v28 = vpop.f32.mrb[7].mxu0  ;;  %v1165_v6 = vpack.c.bf16 %v465_v1, %v463_v63 }
 0x11c   :  { %v224_v29 = vadd.f32 %v223_v28, %v121_v8  ;;  %v1181_v8 = vpack.c.bf16 %v449_v7, %v447_v4  ;;  %v462_v28 = vld [vmem:[%s1929_s10] sm:$0xff] }
 0x11d   :  { %v232_v31 = vmax.f32 %v222_v27, 0.0  ;;  %v626_v7 = vld [vmem:[%s1935_s11] sm:$0x3] }
 0x11e   :  { %v233_v33 = vmax.f32 %v224_v29, 0.0  ;;  %1182 = vmatprep.subr.bf16.mxu0 %v1181_v8  ;;  %v464_v29 = vld [vmem:[%s1929_s10 + $0x10] sm:$0xff]  ;;  %v631_v8 = vrot.slane %v626_v7, %v116_v3  ;;  %v669_v3 = vld [vmem:[%s1936_s12] sm:$0xff] }
 0x11f   :  { %v236_v34 = vmax.f32 %v230_v30, %v232_v31  ;;  %1184 = vmatpush1.bf16.msra.mxu0 %v1183_v11  ;;  %v467_v30 = vld [vmem:[%s1929_s10 + $0x28] sm:$0xff]  ;;  %v469_v31 = vld [vmem:[%s1929_s10 + $0x38] sm:$0xff] }
 0x120   :  { %v237_v37 = vmax.f32 %v231_v32, %v233_v33  ;;  %1186 = vmatprep.subr.bf16.mxu0 %v1185_v14  ;;  %v1167_v33 = vpack.c.bf16 %v464_v29, %v462_v28  ;;  %v1169_v35 = vpack.c.bf16 %v469_v31, %v467_v30  ;;  %v635_v14 = vrot.slane %v626_v7, %v120_v5  ;;  %v671_v5 = vld [vmem:[%s1936_s12 + $0x10] sm:$0xff]  ;;  %v676_v28 = vld [vmem:[%s1936_s12 + $0x38] sm:$0xff] }
 0x121   :  { %v238_v38 = vmax.f32 %v234_v21, %v236_v34  ;;  %v454_v21 = vld [vmem:[%s1930_s9 + $0x40] sm:$0xff] }
 0x122   :  { %v239_v39 = vmax.f32 %v235_v23, %v237_v37  ;;  %v1191_v23 = vpack.c.bf16 %v456_v22, %v454_v21  ;;  %v468_v37 = vld [vmem:[%s1929_s10 + $0x30] sm:$0xff]  ;;  %v1198_v21 = vpack.c.bf16 %v670_v2, %v669_v3  ;;  %v672_v22 = vld [vmem:[%s1936_s12 + $0x18] sm:$0xff] }
 0x123   :  { %1188 = vmatpush1.bf16.msra.mxu0 %v1187_v17 }
 0x124   :  { %343 = vmatprep.mubr.f32.mxu1 %v239_v39  ;;  %1190 = vmatprep.subr.bf16.mxu0 %v1189_v20  ;;  %v473_v39 = vld [vmem:[%s1929_s10 + $0x58] sm:$0xff] }
 0x125   :  { %344 = vmatmul.mubr.f32.vlgmr.msra.gmra.mrb[0].mxu1 %v238_v38  ;;  %v471_v38 = vld [vmem:[%s1929_s10 + $0x48] sm:$0xff] }
 0x126   :  { %1143 = vmatpush3.bf16.msra.mxu1 %v1142_v40  ;;  %1004 = vmatprep.mubr.msk.f32.mxu1 %vm1255_vm1, %v1256_v62  ;;  %v1171_v40 = vpack.c.bf16 %v468_v37, %v466_v36  ;;  %v1173_v41 = vpack.c.bf16 %v473_v39, %v471_v38  ;;  %v757_v36 = vld [vmem:[%s1937_s14] sm:$0xff]  ;;  %v758_v37 = vld [vmem:[%s1937_s14 + $0x8] sm:$0xff]  ;;  %v759_v38 = vld [vmem:[%s1937_s14 + $0x10] sm:$0xff] }
 0x127   :  { %1144 = vmatprep.subr.bf16.mxu1 %v1254_v0  ;;  %1192 = vmatpush1.bf16.msra.mxu0 %v1191_v23  ;;  %v1201_v23 = vpack.c.bf16 %v672_v22, %v671_v5  ;;  %v1210_v39 = vpack.c.bf16 %v758_v37, %v757_v36 }
 0x12a   :  { %1146 = vmatpush3.bf16.msra.mxu1 %v1145_v43  ;;  %v472_v43 = vld [vmem:[%s1929_s10 + $0x50] sm:$0xff] }
 0x12b   :  { %1147 = vmatprep.subr.bf16.mxu1 %v1254_v0  ;;  %v1175_v44 = vpack.c.bf16 %v472_v43, %v470_v42  ;;  %v761_v43 = vld [vmem:[%s1937_s14 + $0x20] sm:$0xff] }
 0x12e   :  { %1149 = vmatpush3.bf16.msra.mxu1 %v1148_v46  ;;  %v477_v46 = vld [vmem:[%s1929_s10 + $0x78] sm:$0xff] }
 0x12f   :  { %1150 = vmatprep.subr.bf16.mxu1 %v1254_v0  ;;  %v1177_v47 = vpack.c.bf16 %v477_v46, %v475_v45 }
 0x132   :  { %1152 = vmatpush3.bf16.msra.mxu1 %v1151_v49  ;;  %v461_v49 = vld [vmem:[%s1930_s9 + $0x78] sm:$0xff]  ;;  %s1257_s9 = smov 64  }
 0x133   :  { %1153 = vmatprep.subr.bf16.mxu1 %v1254_v0  ;;  %v1193_v51 = vpack.c.bf16 %v461_v49, %v459_v48  ;;  %v763_v48 = vld [vmem:[%s1937_s14 + $0x30] sm:$0xff]  ;;  %v764_v49 = vld [vmem:[%s1937_s14 + $0x38] sm:$0xff] }
 0x135   :  { %1194 = vmatprep.subr.bf16.mxu0 %v1193_v51  ;;  %v1219_v51 = vpack.c.bf16 %v764_v49, %v763_v48 }
 0x136   :  { %1155 = vmatpush3.bf16.msra.mxu1 %v1154_v52  ;;  %v476_v52 = vld [vmem:[%s1929_s10 + $0x70] sm:$0xff]  ;;  %1196 = vmatpush1.bf16.msra.mxu0 %v1195_v56 }
 0x137   :  { %1156 = vmatprep.subr.bf16.mxu1 %v1254_v0  ;;  %1209 = vmatprep.subr.bf16.mxu0 %v1254_v0  ;;  %v767_v56 = vld [vmem:[%s1937_s14 + $0x50] sm:$0xff] }
 0x13a   :  { %1158 = vmatpush3.bf16.msra.mxu1 %v1157_v55  ;;  %v1179_v55 = vpack.c.bf16 %v476_v52, %v474_v50  ;;  %v765_v52 = vld [vmem:[%s1937_s14 + $0x40] sm:$0xff] }
 0x13b   :  { %1159 = vmatprep.subr.bf16.mxu1 %v1254_v0  ;;  %v1222_v54 = vpack.c.bf16 %v766_v53, %v765_v52 }
 0x13e   :  { %1161 = vmatpush3.bf16.msra.mxu1 %v1160_v58  ;;  %v445_v58 = vld [vmem:[%s1933_s2] sm:$0xff] }
 0x13f   :  { %1162 = vmatprep.subr.bf16.mxu1 %v1254_v0  ;;  %650 = vrot.lane.b32.xlu0 %v445_v58, %s1257_s9 }
 0x142   :  { %1164 = vmatpush3.bf16.msra.mxu1 %v1163_v61 }
 0x143   :  { %1166 = vmatprep.subr.bf16.mxu1 %v1165_v6 }
 0x1b1   :  { %v651_v31 = vpop.permute.xlu0 %650 }
 0x1f8   :  { %v926_v24 = vpop.f32.mrb[0].mxu1 }
 0x1f9   :  { %v927_v26 = vpop.f32.mrb[1].mxu1 }
 0x1fa   :  { %v928_v27 = vadd.f32 %v927_v26, %v926_v24  ;;  %v673_v24 = vld [vmem:[%s1936_s12 + $0x20] sm:$0xff] }
 0x1fc   :  { %v346_v32 = vadd.f32 %v928_v27, %v887_v25  ;;  %v674_v25 = vld [vmem:[%s1936_s12 + $0x28] sm:$0xff]  ;;  %v675_v27 = vld [vmem:[%s1936_s12 + $0x30] sm:$0xff] }
 0x1fd   :  { %v1204_v26 = vpack.c.bf16 %v674_v25, %v673_v24  ;;  %v1207_v29 = vpack.c.bf16 %v676_v28, %v675_v27 }
 0x1fe   :  { %v349_v34 = vmax.f32 %v346_v32, 0.0 }
 0x200   :  { %1005 = vmatmul.mubr.f32.vlgmr.msra.gmra.mrb[2].mxu1 %v349_v34 }
 0x201   :  { %1168 = vmatpush1.bf16.msra.mxu1 %v1167_v33  ;;  %545 = vmatprep.mubr.f32.mxu1 %v1256_v62 }
 0x202   :  { %1170 = vmatprep.subr.bf16.mxu1 %v1169_v35 }
 0x205   :  { %1172 = vmatpush1.bf16.msra.mxu1 %v1171_v40  ;;  %v760_v40 = vld [vmem:[%s1937_s14 + $0x18] sm:$0xff] }
 0x206   :  { %1174 = vmatprep.subr.bf16.mxu1 %v1173_v41  ;;  %v1213_v42 = vpack.c.bf16 %v760_v40, %v759_v38 }
 0x209   :  { %1176 = vmatpush1.bf16.msra.mxu1 %v1175_v44  ;;  %v762_v44 = vld [vmem:[%s1937_s14 + $0x28] sm:$0xff] }
 0x20a   :  { %1178 = vmatprep.subr.bf16.mxu1 %v1177_v47  ;;  %v1216_v46 = vpack.c.bf16 %v762_v44, %v761_v43 }
 0x20d   :  { %1180 = vmatpush1.bf16.msra.mxu1 %v1179_v55 }
 0x20e   :  { %1197 = vmatprep.subr.bf16.mxu1 %v1254_v0 }
 0x210   :  { %889 = vmatmul.mubr.msk.f32.vlgmr.msra.gmra.mrb[4].mxu1 %vm124_vm0, %v444_v57  ;;  %v768_v57 = vld [vmem:[%s1937_s14 + $0x58] sm:$0xff] }
 0x211   :  { %1023 = vmatprep.mubr.msk.f32.mxu1 %vm1255_vm1, %v1256_v62  ;;  %1199 = vmatpush3.bf16.msra.mxu1 %v1198_v21  ;;  %v1225_v58 = vpack.c.bf16 %v768_v57, %v767_v56 }
 0x212   :  { %1200 = vmatprep.subr.bf16.mxu1 %v1254_v0 }
 0x215   :  { %1202 = vmatpush3.bf16.msra.mxu1 %v1201_v23 }
 0x216   :  { %1203 = vmatprep.subr.bf16.mxu1 %v1254_v0 }
 0x219   :  { %1205 = vmatpush3.bf16.msra.mxu1 %v1204_v26 }
 0x21a   :  { %1206 = vmatprep.subr.bf16.mxu1 %v1254_v0 }
 0x21d   :  { %1208 = vmatpush3.bf16.msra.mxu1 %v1207_v29 }
 0x2d3   :  { %v439_v60 = vpop.f32.mrb[2].mxu1 }
 0x2d4   :  { %v440_v61 = vadd.f32 %v888_v59, %v439_v60  ;;  %v1006_v63 = vpop.f32.mrb[3].mxu1  ;;  %v769_v59 = vld [vmem:[%s1937_s14 + $0x60] sm:$0xff]  ;;  %v770_v60 = vld [vmem:[%s1937_s14 + $0x68] sm:$0xff] }
 0x2d5   :  { %v771_v63 = vld [vmem:[%s1937_s14 + $0x70] sm:$0xff] }
 0x2d6   :  { %v443_v1 = vmax.f32 %v440_v61, 0.0  ;;  %v1228_v61 = vpack.c.bf16 %v770_v60, %v769_v59 }
 0x2d8   :  { %890 = vmatmul.mubr.msk.f32.vlgmr.msra.gmra.mrb[8].mxu0 %vm124_vm0, %v443_v1  ;;  %v772_v1 = vld [vmem:[%s1937_s14 + $0x78] sm:$0xff] }
 0x2d9   :  { %1058 = vmatprep.mubr.msk.f32.mxu0 %vm1255_vm1, %v1256_v62  ;;  %1211 = vmatpush3.bf16.msra.mxu0 %v1210_v39 }
 0x2da   :  { %1212 = vmatprep.subr.bf16.mxu0 %v1254_v0 }
 0x2dd   :  { %1214 = vmatpush3.bf16.msra.mxu0 %v1213_v42 }
 0x2de   :  { %1215 = vmatprep.subr.bf16.mxu0 %v1254_v0 }
 0x2e1   :  { %1217 = vmatpush3.bf16.msra.mxu0 %v1216_v46 }
 0x2e2   :  { %1218 = vmatprep.subr.bf16.mxu0 %v1254_v0 }
 0x2e3   :  { %v547_v4 = vpop.f32.mrb[4].mxu1 }
 0x2e4   :  { %v549_v6 = vpop.f32.mrb[5].mxu1 }
 0x2e5   :  { %1220 = vmatpush3.bf16.msra.mxu0 %v1219_v51 }
 0x2e6   :  { %1221 = vmatprep.subr.bf16.mxu0 %v1254_v0 }
 0x2e9   :  { %1223 = vmatpush3.bf16.msra.mxu0 %v1222_v54 }
 0x2ea   :  { %1224 = vmatprep.subr.bf16.mxu0 %v1254_v0 }
 0x2ed   :  { %1226 = vmatpush3.bf16.msra.mxu0 %v1225_v58 }
 0x2ee   :  { %1227 = vmatprep.subr.bf16.mxu0 %v1254_v0 }
 0x2f1   :  { %1229 = vmatpush3.bf16.msra.mxu0 %v1228_v61 }
 0x2f2   :  { %1230 = vmatprep.subr.bf16.mxu0 %v1254_v0 }
 0x3ab   :  { %v621_v9 = vpop.f32.mrb[8].mxu0 }
 0x3ac   :  { %v622_v10 = vadd.f32 %v621_v9, %v547_v4  ;;  %v623_v11 = vpop.f32.mrb[9].mxu0  ;;  %v1231_v4 = vpack.c.bf16 %v772_v1, %v771_v63 }
 0x3ad   :  { %v624_v12 = vadd.f32 %v623_v11, %v549_v6  ;;  %v891_v6 = vld [vmem:[%s1939_s13] ss:$0 sm:$0xff]  ;;  %s1258_s13 = smov 121  }
 0x3ae   :  { %v638_v13 = vadd.f32 %v631_v8, %v622_v10  ;;  %1232 = vmatpush3.bf16.msra.mxu0 %v1231_v4  ;;  %v893_v11 = vld [vmem:[%s1940_s15] ss:$0 sm:$0xff] }
 0x3af   :  { %v639_v62 = vadd.f32 %v635_v14, %v624_v12 }
 0x3b0   :  { %v640_v15 = vmul.f32 0.5, %v638_v13 }
 0x3b1   :  { %v645_v30 = vmul.f32 0.5, %v639_v62 }
 0x3b2   :  { %1240 = vtanh.f32 %v640_v15 }
 0x3b3   :  { %1242 = vtanh.f32 %v639_v62 }
 0x3b4   :  { %1244 = vtanh.f32 %v645_v30 }
 0x3bc   :  { %v1241_v16 = vpop.eup %1240 }
 0x3bd   :  { %v642_v17 = vmul.f32 0.5, %v1241_v16  ;;  %v1243_v19 = vpop.eup %1242 }
 0x3be   :  { %v1245_v35 = vpop.eup %1244 }
 0x3bf   :  { %v643_v18 = vadd.f32 0.5, %v642_v17  ;;  %v647_v41 = vmul.f32 0.5, %v1245_v35 }
 0x3c1   :  { %v654_v20 = vmul.f32 %v1243_v19, %v643_v18  ;;  %v653_v32 = vmul.f32 %v651_v31, %v643_v18  ;;  %v648_v45 = vadd.f32 0.5, %v647_v41 }
 0x3c3   :  { %656 = vrot.lane.b32.xlu0 %v654_v20, %s1257_s9 }
 0x435   :  { %v657_v33 = vpop.permute.xlu0 %656 }
 0x436   :  { %v659_v34 = vadd.f32 %v657_v33, %v653_v32 }
 0x438   :  { %1246 = vtanh.f32 %v659_v34 }
 0x442   :  { %v1247_v47 = vpop.eup %1246 }
 0x443   :  { %v661_v50 = vmul.f32 %v1247_v47, %v648_v45 }
 0x445   :  { %663 = vrot.lane.b32.xlu1 %v661_v50, %s1257_s9 }
 0x4b7   :  { %v664_v55 = vpop.permute.xlu1 %663 }
 0x4b8   :  { %666 = vst.msk [vmem:[%s1938_s18] sm:$0xff] %vm124_vm0, %v664_v55  ;;  %1024 = vmatmul.mubr.msk.f32.vlgmr.msra.gmra.mrb[6].mxu1 %vm124_vm0, %v664_v55 }
 0x4b9   :  { %668 = vst.msk [vmem:[%s1938_s18] sm:$0xff] %vm667_vm2, %v659_v34 }
 0x58b   :  { %v752_v7 = vpop.f32.mrb[6].mxu1 }
 0x58c   :  { %v753_v8 = vadd.f32 %v891_v6, %v752_v7  ;;  %v1025_v9 = vpop.f32.mrb[7].mxu1 }
 0x58e   :  { %1248 = vtanh.f32 %v753_v8 }
 0x598   :  { %v1249_v10 = vpop.eup %1248 }
 0x599   :  { %1059 = vmatmul.mubr.f32.vlgmr.msra.gmra.mrb[10].mxu0 %v1249_v10 }
 0x66c   :  { %v846_v12 = vpop.f32.mrb[10].mxu0 }
 0x66d   :  { %v847_v13 = vadd.f32 %v893_v11, %v846_v12  ;;  %v1060_v14 = vpop.f32.mrb[11].mxu0 }
 0x66f   :  { %v851_v0 = vsel %vm850_vm3, %v847_v13, -inf }
 0x670   :  { %852 = vmax.xlane.f32.xlu1 %v851_v0 }
 0x6fd   :  { %v853_v15 = vpop.xlane.xlu1 %852 }
 0x6fe   :  { %v854_v62 = vsub.f32 %v847_v13, %v853_v15 }
 0x700   :  { %v855_v16 = vmul.f32 1.442695, %v854_v62 }
 0x702   :  { %1250 = vpow2.f32 %v855_v16 }
 0x70c   :  { %v1251_v17 = vpop.eup %1250 }
 0x70d   :  { %v857_v18 = vsel %vm850_vm3, %v1251_v17, 0.0 }
 0x70e   :  { %858 = vadd.xlane.f32.xlu0 %v857_v18 }
 0x724   :  { %866 = vrot.lane.b32.xlu0 %v847_v13, %s1258_s13 }
 0x79b   :  { %v859_v19 = vpop.xlane.xlu0 %858 }
 0x79c   :  { %1252 = vlog2.f32 %v859_v19 }
 0x79f   :  { %v867_v20 = vpop.permute.xlu0 %866 }
 0x7a0   :  { %870 = vst.msk [vmem:[%s1941_s17] sm:$0xff] %vm869_vm4, %v867_v20 }
 0x7a6   :  { %v1253_v3 = vpop.eup %1252 }
 0x7a7   :  { %v861_v2 = vmul.f32 0.6931472, %v1253_v3 }
 0x7a9   :  { %v862_v5 = vadd.f32 %v861_v2, %v853_v15 }
 0x7ab   :  { %v863_v21 = vsub.f32 %v847_v13, %v862_v5 }
 0x7ad   :  { %864 = vst.msk [vmem:[%s1942_s16] sm:$0xff] %vm850_vm3, %v863_v21 }

</bundles_post_ra>
